<compile_context>
chip_gen: v6e
topology: v6e:2x2x1
jax: 0.10.0
libtpu: 0.0.40
codegen_flags: <defaults>
</compile_context>

<pallas_src>
import jax
import jax.numpy as jnp
from jax import lax
from jax.experimental import pallas as pl
from jax.experimental.pallas import tpu as pltpu


def _round_up(v, m):
    return ((v + m - 1) // m) * m


def _textcnn_kernel(x_ref, w_ref, b_ref, o_ref):
    """One row-tile of the fused multi-branch conv1d + BN + ReLU.

    x_ref: (1, TM + 2*p_max, D)   haloed input rows for this tile
    w_ref: (S, D, F_total)        per-shift packed (BN-folded) weights, S = 2*p_max + 1
    b_ref: (1, F_total)           packed (BN-folded) bias
    o_ref: (TM, F_total)          lane-dense output tile
    """
    TM, F_total = o_ref.shape
    S = w_ref.shape[0]
    xt = x_ref[0]                                  # (TM + 2*p_max, D)
    acc = jnp.zeros((TM, F_total), jnp.float32)
    for s in range(S):                             # small static loop over shifts
        acc = acc + jnp.dot(xt[s:s + TM, :], w_ref[s],
                            preferred_element_type=jnp.float32)
    acc = acc + b_ref[...]                         # broadcast (1, F_total)
    o_ref[...] = jnp.maximum(acc, 0.0).astype(o_ref.dtype)


def textcnn_forward(x, branch_params, *, bn_eps=1e-5, tile_rows=512):
    """TextCNN forward.

    x: (B, L, D) float32
    branch_params: list of (W, b, gamma, beta, mean, var) with
        W: (F, D, k) conv weight (PyTorch Conv1d layout), b: (F,) conv bias,
        gamma/beta/mean/var: (F,) BatchNorm1d affine params + running stats.
    Returns (B, L, nBranch * F).
    """
    B, L, D = x.shape
    ks = [int(p[0].shape[-1]) for p in branch_params]
    # The PyTorch module only composes (cat along channels) when all context
    # sizes are odd (even sizes change the output length); require that here.
    assert all(k % 2 == 1 for k in ks), "context sizes must be odd"
    F = int(branch_params[0][0].shape[0])
    nb = len(branch_params)
    F_total = nb * F
    pads = [k // 2 for k in ks]
    p_max = max(pads)
    S = 2 * p_max + 1

    # ---- Fold BatchNorm (inference) into the conv, pack all branches/taps by shift.
    # TODO(synk): training-mode BatchNorm (batch statistics + running-stat update)
    # is not implemented; inference-mode BN is folded into the conv instead.
    w_pack = jnp.zeros((S, D, F_total), jnp.float32)
    b_parts = []
    for i, (W, b, gamma, beta, mean, var) in enumerate(branch_params):
        k = int(W.shape[-1])
        p = k // 2
        scale = gamma / jnp.sqrt(var + bn_eps)                  # (F,)
        Wf = W.astype(jnp.float32) * scale[:, None, None]       # (F, D, k)
        bf = (b - mean) * scale + beta                          # (F,)
        for t in range(k):
            s_idx = (t - p) + p_max
            w_pack = w_pack.at[s_idx, :, i * F:(i + 1) * F].set(Wf[:, :, t].T)
        b_parts.append(bf.astype(jnp.float32))
    b_pack = jnp.concatenate(b_parts)[None, :]                  # (1, F_total)

    # ---- Collapse (batch, padded sequence) into one row axis so each grid step is
    # one big (TM, D) x (D, F_total) matmul chain with a lane-dense output store.
    Lp = L + 2 * p_max
    R = B * Lp                                  # rows of flattened, padded sequences
    if R >= 16:
        # keep >= 2 row tiles so the "parallel" grid axis can feed both TCs (v7x)
        TM = min(_round_up(tile_rows, 8), _round_up(-(-R // 2), 8))
    else:
        TM = _round_up(R, 8)
    G = -(-R // TM)
    Rp = G * TM

    xpad = jnp.zeros((B, Lp, D), x.dtype).at[:, p_max:p_max + L, :].set(x)
    xflat = xpad.reshape(R, D)
    xext = jnp.zeros((Rp + 2 * p_max, D), x.dtype).at[p_max:p_max + R, :].set(xflat)
    # Haloed row slabs: tile m needs rows [m*TM, m*TM + TM + 2*p_max) of xext.
    row_idx = jnp.arange(G)[:, None] * TM + jnp.arange(TM + 2 * p_max)[None, :]
    x_halo = xext[row_idx]                      # (G, TM + 2*p_max, D)

    itemsize = 4
    cost = pl.CostEstimate(
        flops=2 * Rp * D * F_total * S,
        transcendentals=0,
        bytes_accessed=itemsize * (int(x_halo.size) + int(w_pack.size)
                                   + int(b_pack.size) + Rp * F_total),
    )

    out_flat = pl.pallas_call(
        _textcnn_kernel,
        out_shape=jax.ShapeDtypeStruct((Rp, F_total), x.dtype),
        grid=(G,),
        in_specs=[
            pl.BlockSpec((1, TM + 2 * p_max, D), lambda m: (m, 0, 0)),  # row slab
            pl.BlockSpec((S, D, F_total), lambda m: (0, 0, 0)),  # resident weights
            pl.BlockSpec((1, F_total), lambda m: (0, 0)),        # packed bias
        ],
        out_specs=pl.BlockSpec((TM, F_total), lambda m: (m, 0)),
        compiler_params=pltpu.CompilerParams(
            dimension_semantics=("parallel",),
            vmem_limit_bytes=32 * 1024 * 1024),
        cost_estimate=cost,
    )(x_halo, w_pack, b_pack)

    # Drop padding rows and un-flatten back to (B, L, F_total).
    out = out_flat[:R].reshape(B, Lp, F_total)[:, p_max:p_max + L, :]
    return out


def reference_forward(x, branch_params, *, bn_eps=1e-5):
    """Pure-JAX reproduction of the PyTorch TextCNN forward (BN in eval mode)."""
    xt = jnp.swapaxes(x, 1, 2)                  # (B, D, L)
    outs = []
    for (W, b, gamma, beta, mean, var) in branch_params:
        k = int(W.shape[-1])
        p = k // 2
        y = lax.conv_general_dilated(
            xt, W, window_strides=(1,), padding=[(p, p)],
            dimension_numbers=("NCH", "OIH", "NCH"))
        y = y + b[None, :, None]
        y = (y - mean[None, :, None]) / jnp.sqrt(var[None, :, None] + bn_eps)
        y = gamma[None, :, None] * y + beta[None, :, None]
        outs.append(jnp.maximum(y, 0.0))
    out = jnp.concatenate(outs, axis=1)         # (B, F_total, L)
    return jnp.swapaxes(out, 1, 2)              # (B, L, F_total)


if __name__ == "__main__":
    key = jax.random.PRNGKey(0)
    B, L, D = 2, 16, 32                  # batch, seq len, feaSize
    context_sizes = [1, 3, 5]
    filter_num = 32

    keys = jax.random.split(key, 1 + 6 * len(context_sizes))
    x = jax.random.normal(keys[0], (B, L, D), dtype=jnp.float32)

    branch_params = []
    for i, k in enumerate(context_sizes):
        kk = keys[1 + 6 * i: 1 + 6 * (i + 1)]
        bound = 1.0 / jnp.sqrt(jnp.float32(D * k))   # ~ PyTorch Conv1d init bound
        W = jax.random.uniform(kk[0], (filter_num, D, k), jnp.float32, -bound, bound)
        b = jax.random.uniform(kk[1], (filter_num,), jnp.float32, -bound, bound)
        gamma = jax.random.uniform(kk[2], (filter_num,), jnp.float32, 0.5, 1.5)
        beta = jax.random.uniform(kk[3], (filter_num,), jnp.float32, -0.5, 0.5)
        mean = jax.random.uniform(kk[4], (filter_num,), jnp.float32, -0.5, 0.5)
        var = jax.random.uniform(kk[5], (filter_num,), jnp.float32, 0.5, 1.5)
        branch_params.append((W, b, gamma, beta, mean, var))

    out = textcnn_forward(x, branch_params)
    out = jax.block_until_ready(out)

    ref = reference_forward(x, branch_params)
    assert out.shape == (B, L, filter_num * len(context_sizes)), out.shape
    assert jnp.allclose(out, ref, atol=1e-4, rtol=1e-4), \
        float(jnp.max(jnp.abs(out - ref)))

    print("KERNEL_OK")
</pallas_src>

<mosaic_0001>
module attributes {stable_mosaic.version = 11 : i64} {
  func.func @_textcnn_kernel(%arg0: i32, %arg1: memref<1x28x32xf32, #tpu.memory_space<vmem>>, %arg2: memref<5x32x96xf32, #tpu.memory_space<vmem>>, %arg3: memref<1x96xf32, #tpu.memory_space<vmem>>, %arg4: memref<24x96xf32, #tpu.memory_space<vmem>>) attributes {dimension_semantics = [#tpu.dimension_semantics<parallel>], iteration_bounds = array<i64: 2>, scalar_prefetch = 0 : i64, scratch_operands = 0 : i64, tpu.core_type = #tpu.core_type<tc>, window_params = [{transform_indices = @transform_0, window_bounds = array<i64: 1, 28, 32>}, {pipeline_mode = #tpu.pipeline_mode<synchronous>, transform_indices = @transform_1, window_bounds = array<i64: 5, 32, 96>}, {pipeline_mode = #tpu.pipeline_mode<synchronous>, transform_indices = @transform_2, window_bounds = array<i64: 1, 96>}, {transform_indices = @transform_3, window_bounds = array<i64: 24, 96>}]} {
    %c0 = arith.constant 0 : index
    %c0_0 = arith.constant 0 : index
    %c0_1 = arith.constant 0 : index
    %0 = vector.load %arg1[%c0, %c0_0, %c0_1] : memref<1x28x32xf32, #tpu.memory_space<vmem>>, vector<1x28x32xf32>
    %1 = vector.shape_cast %0 : vector<1x28x32xf32> to vector<28x32xf32>
    %cst = arith.constant 0.000000e+00 : f32
    %2 = vector.broadcast %cst : f32 to vector<24x96xf32>
    %3 = vector.extract_strided_slice %1 {offsets = [0, 0], sizes = [24, 32], strides = [1, 1]} : vector<28x32xf32> to vector<24x32xf32>
    %c0_2 = arith.constant 0 : index
    %c0_3 = arith.constant 0 : index
    %c0_4 = arith.constant 0 : index
    %4 = vector.load %arg2[%c0_2, %c0_3, %c0_4] : memref<5x32x96xf32, #tpu.memory_space<vmem>>, vector<1x32x96xf32>
    %5 = vector.shape_cast %4 : vector<1x32x96xf32> to vector<32x96xf32>
    %cst_5 = arith.constant dense<0.000000e+00> : vector<24x96xf32>
    %6 = tpu.matmul %3, %5, %cst_5 {dimension_numbers = #tpu.dot_dimension_numbers<[1], [0], [0], [1], [0, 0, 1, 1], [], []>} : vector<24x32xf32>, vector<32x96xf32>, vector<24x96xf32> -> vector<24x96xf32>
    %7 = arith.addf %2, %6 : vector<24x96xf32>
    %8 = vector.extract_strided_slice %1 {offsets = [1, 0], sizes = [24, 32], strides = [1, 1]} : vector<28x32xf32> to vector<24x32xf32>
    %c1 = arith.constant 1 : index
    %c0_6 = arith.constant 0 : index
    %c0_7 = arith.constant 0 : index
    %9 = vector.load %arg2[%c1, %c0_6, %c0_7] : memref<5x32x96xf32, #tpu.memory_space<vmem>>, vector<1x32x96xf32>
    %10 = vector.shape_cast %9 : vector<1x32x96xf32> to vector<32x96xf32>
    %cst_8 = arith.constant dense<0.000000e+00> : vector<24x96xf32>
    %11 = tpu.matmul %8, %10, %cst_8 {dimension_numbers = #tpu.dot_dimension_numbers<[1], [0], [0], [1], [0, 0, 1, 1], [], []>} : vector<24x32xf32>, vector<32x96xf32>, vector<24x96xf32> -> vector<24x96xf32>
    %12 = arith.addf %7, %11 : vector<24x96xf32>
    %13 = vector.extract_strided_slice %1 {offsets = [2, 0], sizes = [24, 32], strides = [1, 1]} : vector<28x32xf32> to vector<24x32xf32>
    %c2 = arith.constant 2 : index
    %c0_9 = arith.constant 0 : index
    %c0_10 = arith.constant 0 : index
    %14 = vector.load %arg2[%c2, %c0_9, %c0_10] : memref<5x32x96xf32, #tpu.memory_space<vmem>>, vector<1x32x96xf32>
    %15 = vector.shape_cast %14 : vector<1x32x96xf32> to vector<32x96xf32>
    %cst_11 = arith.constant dense<0.000000e+00> : vector<24x96xf32>
    %16 = tpu.matmul %13, %15, %cst_11 {dimension_numbers = #tpu.dot_dimension_numbers<[1], [0], [0], [1], [0, 0, 1, 1], [], []>} : vector<24x32xf32>, vector<32x96xf32>, vector<24x96xf32> -> vector<24x96xf32>
    %17 = arith.addf %12, %16 : vector<24x96xf32>
    %18 = vector.extract_strided_slice %1 {offsets = [3, 0], sizes = [24, 32], strides = [1, 1]} : vector<28x32xf32> to vector<24x32xf32>
    %c3 = arith.constant 3 : index
    %c0_12 = arith.constant 0 : index
    %c0_13 = arith.constant 0 : index
    %19 = vector.load %arg2[%c3, %c0_12, %c0_13] : memref<5x32x96xf32, #tpu.memory_space<vmem>>, vector<1x32x96xf32>
    %20 = vector.shape_cast %19 : vector<1x32x96xf32> to vector<32x96xf32>
    %cst_14 = arith.constant dense<0.000000e+00> : vector<24x96xf32>
    %21 = tpu.matmul %18, %20, %cst_14 {dimension_numbers = #tpu.dot_dimension_numbers<[1], [0], [0], [1], [0, 0, 1, 1], [], []>} : vector<24x32xf32>, vector<32x96xf32>, vector<24x96xf32> -> vector<24x96xf32>
    %22 = arith.addf %17, %21 : vector<24x96xf32>
    %23 = vector.extract_strided_slice %1 {offsets = [4, 0], sizes = [24, 32], strides = [1, 1]} : vector<28x32xf32> to vector<24x32xf32>
    %c4 = arith.constant 4 : index
    %c0_15 = arith.constant 0 : index
    %c0_16 = arith.constant 0 : index
    %24 = vector.load %arg2[%c4, %c0_15, %c0_16] : memref<5x32x96xf32, #tpu.memory_space<vmem>>, vector<1x32x96xf32>
    %25 = vector.shape_cast %24 : vector<1x32x96xf32> to vector<32x96xf32>
    %cst_17 = arith.constant dense<0.000000e+00> : vector<24x96xf32>
    %26 = tpu.matmul %23, %25, %cst_17 {dimension_numbers = #tpu.dot_dimension_numbers<[1], [0], [0], [1], [0, 0, 1, 1], [], []>} : vector<24x32xf32>, vector<32x96xf32>, vector<24x96xf32> -> vector<24x96xf32>
    %27 = arith.addf %22, %26 : vector<24x96xf32>
    %c0_18 = arith.constant 0 : index
    %c0_19 = arith.constant 0 : index
    %28 = vector.load %arg3[%c0_18, %c0_19] : memref<1x96xf32, #tpu.memory_space<vmem>>, vector<1x96xf32>
    %29 = vector.broadcast %28 : vector<1x96xf32> to vector<24x96xf32>
    %30 = arith.addf %27, %29 : vector<24x96xf32>
    %cst_20 = arith.constant 0.000000e+00 : f32
    %31 = vector.broadcast %cst_20 : f32 to vector<24x96xf32>
    %32 = arith.maximumf %30, %31 : vector<24x96xf32>
    %c0_21 = arith.constant 0 : index
    %c0_22 = arith.constant 0 : index
    %33 = vector.load %arg4[%c0_21, %c0_22] : memref<24x96xf32, #tpu.memory_space<vmem>>, vector<24x96xf32>
    tpu.vector_store %arg4[%c0_21, %c0_22], %32 {strides = array<i32>} : memref<24x96xf32, #tpu.memory_space<vmem>>, vector<24x96xf32>,
    return
  }
  func.func @transform_0(%arg0: i32) -> (i32, i32, i32) {
    %c0_i32 = arith.constant 0 : i32
    %c0_i32_0 = arith.constant 0 : i32
    %c0_i32_1 = arith.constant 0 : i32
    return %arg0, %c0_i32, %c0_i32_0 : i32, i32, i32
  }
  func.func @transform_1(%arg0: i32) -> (i32, i32, i32) {
    %c0_i32 = arith.constant 0 : i32
    %c0_i32_0 = arith.constant 0 : i32
    %c0_i32_1 = arith.constant 0 : i32
    %c0_i32_2 = arith.constant 0 : i32
    return %c0_i32, %c0_i32_0, %c0_i32_1 : i32, i32, i32
  }
  func.func @transform_2(%arg0: i32) -> (i32, i32) {
    %c0_i32 = arith.constant 0 : i32
    %c0_i32_0 = arith.constant 0 : i32
    %c0_i32_1 = arith.constant 0 : i32
    return %c0_i32, %c0_i32_0 : i32, i32
  }
  func.func @transform_3(%arg0: i32) -> (i32, i32) {
    %c0_i32 = arith.constant 0 : i32
    %c0_i32_0 = arith.constant 0 : i32
    return %arg0, %c0_i32 : i32, i32
  }
}

</mosaic_0001>

<bundles_post_ra>
// kernel: tpu_custom_call.1
= control target key start
LH: loop header
LB: loop body
LE: loop exit
PB: predicated region body
PF: predicated region fallthrough
CT: control target
= control target key end

     0   :  { %8 = vsyncpa [#allocation3], 0  ;;  %s1366_s0 = inlined_call_operand.vmem [shape: f32[2,28,32], index: 0, kind: input, shape index: {}]   ;;  %s1367_s1 = inlined_call_operand.hbm [shape: f32[5,32,96], index: 1, kind: input, shape index: {}]   ;;  %s1368_s2 = inlined_call_operand.vmem [shape: f32[1,96], index: 2, kind: input, shape index: {}]   ;;  %s1369_s3 = inlined_call_operand.hbm [shape: f32[48,96], index: 3, kind: output, shape index: {}]  }
   0x1   :  { %9 = vsyncpa [#allocation4], 0 }
   0x2   :  { %11 = vsyncpa [#allocation4 + $0x1], 0  ;;  %s1128_s12 = smov 0   ;;  %s1130_s13 = smov 0  }
   0x3   :  { %s1132_s14 = smov 0   ;;  %s1134_s15 = smov 0  }
   0x4 LB: > { %s1149_s16 = sadd.s32 4294967295, %s1098_s15   ;;  %s794_s17 = sadd.s32 4294967294, %s1098_s15   ;;  %s1098_s15 = sphi %s1134_s15, %s1377_s15   ;;  %s1094_s14 = sphi %s1132_s14, %s1376_s14   ;;  %s1090_s13 = sphi %s1130_s13, %s1375_s13   ;;  %s1086_s12 = sphi %s1128_s12, %s1374_s12  }
   0x5   : > { %s1153_s18 = sadd.s32 1, %s1098_s15   ;;  %s92_s19 = sadd.s32 1, %s1094_s14 }
   0x6   : > { %s89_s20 = ssub.s32 %s1098_s15, %s1153_s18  ;;  %p102_p0 = scmp.ne.s32.totalorder %s1094_s14, %s1090_s13 }
   0x7   : > { %p90_p1 = scmp.eq.s32.totalorder %s89_s20, 0  ;;  %p103_p2 = scmp.eq.s32.totalorder %s1149_s16, 1 }
   0x8   : > { %p108_p3 = scmp.ne.s32.totalorder %s1090_s13, %s1086_s12  ;;  %p109_p4 = scmp.eq.s32.totalorder %s794_s17, 1 }
   0x9   : > { %s1164_s21 = scalar_select %p90_p1, %s1094_s14, %s92_s19  }
   0xa   : > { %p1166_p5 = por %p103_p2, %p102_p0  ;;  %p1170_p6 = por %p109_p4, %p108_p3 }
   0xb   : > { %p795_p7 = scmp.ge.s32.totalorder %s1098_s15, 1  ;;  %p116_p8 = scmp.lt.s32.totalorder %s1098_s15, 3 }
   0xc   : > { %s1371_s23 = scalar_select %p1170_p6, 1, 0 }
   0xd   : > { %p966_p9 = scmp.eq.s32.totalorder %s1149_s16, 0  ;;  %p1177_p10 = pnand %p795_p7, %p116_p8 }
   0xe   : > { %s1100_s25 = smov [#allocation2]  }
   0xf   : > { %s128_s26 = sshll.u32 %s1100_s25, 4  ;;  %p958_p11 = pneg %p1177_p10  ;;  %s129_s26 = int_to_ptr.vmem [resolvable:$true] %s128_s26 }
  0x10   : > { %s1019_s27 = scalar_lea.vmem %s129_s26, 2560  ;;  %p1027_p3 = scmp.lt.s32.totalorder %s129_s26, %s129_s26 }
  0x11   : > { %p959_p12 = pnand %p966_p9, %p958_p11  ;;  %p1020_p0 = scmp.ne.s32.totalorder %s129_s26, %s1019_s27 }
  0x12   : > { %p1028_p4 = scmp.lt.s32.totalorder %s1019_s27, %s1019_s27 }
  0x13   : > { %p1010_p13 = pneg %p959_p12 }
  0x14   : > { %p1029_p6 = por %p1028_p4, %p1027_p3 }
  0x15   : > { %p1022_p1 = pnand %p1020_p0, %p1010_p13 }
  0x17   : > { %p1023_p2 = pneg %p1022_p1 }
  0x19   : > { %p1030_p7 = pnand %p1029_p6, %p1023_p2 }
  0x1b   : > { %1033 = shalt.err (!%p1030_p7)
}
  0x1c   : > { %s1101_s28 = smov 128   ;;  %s1102_s29 = smov 8  }
  0x1d   : > { %961 = dma.hbm_to_vmem [thread:$0]  (!%p959_p12), %s1367_s1, 2560, %s129_s26, [#allocation3], %s1101_s28, %s1101_s28, %s1102_s29  }
  0x1e   : > { %155 = sbr.rel (%p1177_p10) target bundleno = 293 (0x125), region = 32 }
  0x23   : > { %1077 = dma.done.wait (%p966_p9), [#allocation3], 2560  }
  0x24   : > { %1079 = vsyncadd (%p966_p9), [#allocation3], 4294964736  ;;  %p179_p8 = scmp.lt.s32.totalorder %s1149_s16, 1  ;;  %v1103_v0 = vmov 0.0   ;;  %vm1104_vm0 = vmmov 0   ;;  %v197_v1 = vld [vmem:[#allocation2 + $0x38] sm:$0xff] }
  0x25   : > { %943 = vmatprep.subr.mxu1 %v1103_v0  ;;  %858 = vmatprep.subr.mxu0 %v1103_v0  ;;  %v196_v2 = vld [vmem:[#allocation2 + $0x30] sm:$0xff]  ;;  %v195_v5 = vld [vmem:[#allocation2 + $0x28] sm:$0xff]  ;;  %vm202_vm1 = vcmask 1046528   ;;  %v194_v12 = vld [vmem:[#allocation2 + $0x20] sm:$0xff]  ;;  %vm210_vm2 = vcmask 261120   ;;  %vm388_vm3 = vcmask 1045504  }
  0x26   : > { %872 = vmatprep.mubr.msk.f32.mxu1 %vm1104_vm0, %v1103_v0  ;;  %866 = vmatprep.mubr.msk.f32.mxu0 %vm1104_vm0, %v1103_v0  ;;  %s180_s5 = scalar_select %p179_p8, %s1149_s16, 1  ;;  %v192_v15 = vld [vmem:[#allocation2 + $0x18] sm:$0xff]  ;;  %v191_v17 = vld [vmem:[#allocation2 + $0x10] sm:$0xff]  ;;  %v190_v20 = vld [vmem:[#allocation2 + $0x8] sm:$0xff]  ;;  %vm490_vm4 = vcmask 1044480   ;;  %vm592_vm5 = vcmask 1043456  }
  0x27   : > { %947 = vmatpush3.msra.mxu1 %v197_v1  ;;  %859 = vmatpush3.msra.mxu0 %v197_v1  ;;  %v387_v16 = vld [vmem:[#allocation2 + $0x58] sm:$0xff]  ;;  %v386_v18 = vld [vmem:[#allocation2 + $0x50] sm:$0xff]  ;;  %v385_v21 = vld [vmem:[#allocation2 + $0x48] sm:$0xff]  ;;  %s176_s10 = sand.u32 1, %s1090_s13   ;;  %vm702_vm6 = vcmask 785408   ;;  %s822_s25 = smul.u32 384, %s1149_s16 }
  0x28   : > { %s821_s6 = sshll.u32 %s180_s5, 5  ;;  %944 = vmatprep.subr.mxu1 %v1103_v0  ;;  %860 = vmatprep.subr.mxu0 %v1103_v0  ;;  %v189_v22 = vld [vmem:[#allocation2] sm:$0xff]  ;;  %v489_v27 = vld [vmem:[#allocation2 + $0x78] sm:$0xff]  ;;  %v488_v30 = vld [vmem:[#allocation2 + $0x70] sm:$0xff]  ;;  %s951_s11 = smul.u32 24, %s176_s10 }
  0x29   : > { %s183_s9 = scalar_lea.vmem %s1366_s0, %s821_s6  ;;  %948 = vmatpush3.msra.mxu1 %v196_v2  ;;  %861 = vmatpush3.msra.mxu0 %v196_v2  ;;  %v384_v25 = vld [vmem:[#allocation2 + $0x40] sm:$0xff]  ;;  %v591_v29 = vld [vmem:[#allocation2 + $0x98] sm:$0xff]  ;;  %v590_v33 = vld [vmem:[#allocation2 + $0x90] sm:$0xff]  ;;  %s1321_s28 = scalar_lea.hbm %s1369_s3, %s822_s25 }
  0x2a   : > { %v1205_v3 = vld [vmem:[%s183_s9 + $0x10] sm:$0xff]  ;;  %v1207_v4 = vld [vmem:[%s183_s9 + $0x18] sm:$0xf]  ;;  %v1213_v8 = vld [vmem:[%s183_s9] sm:$0xff]  ;;  %945 = vmatprep.subr.mxu1 %v1103_v0  ;;  %862 = vmatprep.subr.mxu0 %v1103_v0  ;;  %s178_s20 = scalar_lea.vmem [#allocation5], %s951_s11  ;;  %s1326_s29 = scalar_lea.sflag [#allocation4], %s176_s10 }
  0x2b   : > { %v206_v6 = vrot.slane %v1205_v3, 1  ;;  %v208_v7 = vrot.slane %v1207_v4, 1  ;;  %v1215_v9 = vld [vmem:[%s183_s9 + $0x8] sm:$0xff]  ;;  %v203_v10 = vrot.slane %v1213_v8, 1  ;;  %949 = vmatpush3.msra.mxu1 %v195_v5  ;;  %863 = vmatpush3.msra.mxu0 %v195_v5  ;;  %v389_v23 = vrot.slane %v1213_v8, 2  ;;  %v486_v39 = vld [vmem:[#allocation2 + $0x60] sm:$0xff] }
  0x2c   : > { %v204_v11 = vrot.slane %v1215_v9, 1  ;;  %946 = vmatprep.subr.mxu1 %v1103_v0  ;;  %864 = vmatprep.subr.mxu0 %v1103_v0  ;;  %v390_v24 = vrot.slane %v1215_v9, 2  ;;  %v392_v28 = vrot.slane %v1205_v3, 2  ;;  %v394_v32 = vrot.slane %v1207_v4, 2  ;;  %v487_v34 = vld [vmem:[#allocation2 + $0x68] sm:$0xff]  ;;  %v588_v43 = vld [vmem:[#allocation2 + $0x80] sm:$0xff] }
  0x2d   : > { %v209_v13 = vsel %vm202_vm1, %v206_v6, %v208_v7  ;;  %950 = vmatpush3.msra.mxu1 %v194_v12  ;;  %865 = vmatpush3.msra.mxu0 %v194_v12  ;;  %v491_v35 = vrot.slane %v1213_v8, 3  ;;  %v492_v36 = vrot.slane %v1215_v9, 3  ;;  %v589_v38 = vld [vmem:[#allocation2 + $0x88] sm:$0xff]  ;;  %v593_v40 = vrot.slane %v1213_v8, 4  ;;  %s720_s24 = sshll.u32 %s178_s20, 4  ;;  %s1105_s30 = smov [#allocation5]   ;;  %s1316_s24 = int_to_ptr.vmem [resolvable:$true] %s720_s24 }
  0x2e   : > { %v205_v14 = vsel %vm202_vm1, %v203_v10, %v204_v11  ;;  %873 = vmatmul.mubr.msk.f32.vlgmr.msra.gmra.mxu1 %vm210_vm2, %v209_v13  ;;  %875 = vmatprep.subr.mxu1 %v1103_v0  ;;  %v207_v19 = vsel %vm202_vm1, %v204_v11, %v206_v6  ;;  %v391_v26 = vsel %vm388_vm3, %v389_v23, %v390_v24  ;;  %v594_v41 = vrot.slane %v1215_v9, 4  ;;  %v817_v13 = vld [vmem:[%s1368_s2] ss:$0 sm:$0xff]  ;;  %s1034_s16 = scalar_lea.vmem %s1316_s24, 384  ;;  %s1038_s4 = sshll.u32 %s1105_s30, 4  ;;  %s1039_s4 = int_to_ptr.vmem [resolvable:$false] %s1038_s4 }
  0x2f   : > { %867 = vmatmul.mubr.msk.f32.vlgmr.msra.gmra.mxu0 %vm210_vm2, %v205_v14  ;;  %876 = vmatpush3.msra.mxu1 %v192_v15  ;;  %v393_v31 = vsel %vm388_vm3, %v390_v24, %v392_v28  ;;  %v395_v37 = vsel %vm388_vm3, %v392_v28, %v394_v32  ;;  %v493_v42 = vsel %vm490_vm4, %v491_v35, %v492_v36  ;;  %v494_v44 = vrot.slane %v1205_v3, 3  ;;  %p1035_p6 = scmp.ne.s32.totalorder %s1316_s24, %s1034_s16  ;;  %s1040_s5 = scalar_lea.vmem %s1039_s4, 768 }
  0x30   : > { %892 = vmatprep.subr.mxu0 %v1103_v0  ;;  %877 = vmatprep.subr.mxu1 %v1103_v0  ;;  %v595_v45 = vsel %vm592_vm5, %v593_v40, %v594_v41  ;;  %v596_v46 = vrot.slane %v1205_v3, 4  ;;  %v496_v48 = vrot.slane %v1207_v4, 3  ;;  %v598_v50 = vrot.slane %v1207_v4, 4  ;;  %p1041_p11 = scmp.lt.s32.totalorder %s1316_s24, %s1039_s4  ;;  %p1042_p12 = scmp.lt.s32.totalorder %s1040_s5, %s1034_s16 }
  0x31   : > { %893 = vmatpush3.msra.mxu0 %v387_v16  ;;  %878 = vmatpush3.msra.mxu1 %v191_v17  ;;  %v495_v47 = vsel %vm490_vm4, %v492_v36, %v494_v44  ;;  %p1036_p9 = pnand %p1035_p6, %p1166_p5 }
  0x32   : > { %894 = vmatprep.subr.mxu0 %v1103_v0  ;;  %869 = vmatprep.mubr.msk.f32.mxu0 %vm1104_vm0, %v1103_v0  ;;  %v597_v49 = vsel %vm592_vm5, %v594_v41, %v596_v46  ;;  %v497_v51 = vsel %vm490_vm4, %v494_v44, %v496_v48  ;;  %v599_v52 = vsel %vm592_vm5, %v596_v46, %v598_v50  ;;  %p1043_p13 = por %p1042_p12, %p1041_p11 }
  0x33   : > { %879 = vmatprep.subr.mxu1 %v1103_v0  ;;  %895 = vmatpush3.msra.mxu0 %v386_v18  ;;  %p1037_p10 = pneg %p1036_p9 }
  0x34   : > { %870 = vmatmul.mubr.msk.f32.gmra.mxu0 %vm210_vm2, %v207_v19  ;;  %880 = vmatpush3.msra.mxu1 %v190_v20 }
  0x35   : > { %896 = vmatprep.subr.mxu0 %v1103_v0  ;;  %881 = vmatprep.subr.mxu1 %v1103_v0  ;;  %p1044_p0 = pnand %p1043_p13, %p1037_p10 }
  0x36   : > { %897 = vmatpush3.msra.mxu0 %v385_v21  ;;  %882 = vmatpush3.msra.mxu1 %v189_v22 }
  0x37   : > { %883 = vmatprep.mubr.msk.f32.mxu1 %vm1104_vm0, %v1103_v0  ;;  %898 = vmatprep.subr.mxu0 %v1103_v0 }
  0x38   : > { %884 = vmatmul.mubr.msk.f32.vlgmr.msra.gmra.mxu1 %vm210_vm2, %v1213_v8  ;;  %899 = vmatpush3.msra.mxu0 %v384_v25 }
  0x39   : > { %900 = vmatprep.mubr.msk.f32.mxu0 %vm1104_vm0, %v1103_v0  ;;  %909 = vmatprep.subr.mxu1 %v1103_v0 }
  0x3a   : > { %901 = vmatmul.mubr.msk.f32.vlgmr.msra.gmra.mxu0 %vm210_vm2, %v391_v26  ;;  %910 = vmatpush3.msra.mxu1 %v489_v27 }
  0x3b   : > { %926 = vmatprep.subr.mxu0 %v1103_v0  ;;  %886 = vmatprep.mubr.msk.f32.mxu1 %vm1104_vm0, %v1103_v0 }
  0x3c   : > { %911 = vmatprep.subr.mxu1 %v1103_v0  ;;  %927 = vmatpush3.msra.mxu0 %v591_v29 }
  0x3d   : > { %887 = vmatmul.mubr.msk.f32.gmra.mxu1 %vm210_vm2, %v1215_v9  ;;  %903 = vmatprep.mubr.msk.f32.mxu0 %vm1104_vm0, %v1103_v0 }
  0x3e   : > { %912 = vmatpush3.msra.mxu1 %v488_v30  ;;  %904 = vmatmul.mubr.msk.f32.gmra.mxu0 %vm210_vm2, %v393_v31 }
  0x3f   : > { %928 = vmatprep.subr.mxu0 %v1103_v0  ;;  %913 = vmatprep.subr.mxu1 %v1103_v0 }
  0x40   : > { %929 = vmatpush3.msra.mxu0 %v590_v33  ;;  %889 = vmatprep.mubr.msk.f32.mxu1 %vm1104_vm0, %v1103_v0 }
  0x41   : > { %914 = vmatpush3.msra.mxu1 %v487_v34  ;;  %906 = vmatprep.mubr.msk.f32.mxu0 %vm1104_vm0, %v1103_v0 }
  0x42   : > { %890 = vmatmul.mubr.msk.f32.gmra.mxu1 %vm210_vm2, %v1205_v3  ;;  %930 = vmatprep.subr.mxu0 %v1103_v0 }
  0x43   : > { %907 = vmatmul.mubr.msk.f32.gmra.mxu0 %vm210_vm2, %v395_v37  ;;  %915 = vmatprep.subr.mxu1 %v1103_v0 }
  0x44   : > { %931 = vmatpush3.msra.mxu0 %v589_v38  ;;  %916 = vmatpush3.msra.mxu1 %v486_v39 }
  0x45   : > { %917 = vmatprep.mubr.msk.f32.mxu1 %vm1104_vm0, %v1103_v0  ;;  %932 = vmatprep.subr.mxu0 %v1103_v0 }
  0x46   : > { %918 = vmatmul.mubr.msk.f32.vlgmr.msra.gmra.mxu1 %vm210_vm2, %v493_v42  ;;  %933 = vmatpush3.msra.mxu0 %v588_v43 }
  0x47   : > { %934 = vmatprep.mubr.msk.f32.mxu0 %vm1104_vm0, %v1103_v0  ;;  %920 = vmatprep.mubr.msk.f32.mxu1 %vm1104_vm0, %v1103_v0 }
  0x48   : > { %935 = vmatmul.mubr.msk.f32.vlgmr.msra.gmra.mxu0 %vm210_vm2, %v595_v45 }
  0x49   : > { %937 = vmatprep.mubr.msk.f32.mxu0 %vm1104_vm0, %v1103_v0 }
  0x4a   : > { %921 = vmatmul.mubr.msk.f32.gmra.mxu1 %vm210_vm2, %v495_v47 }
  0x4b   : > { %923 = vmatprep.mubr.msk.f32.mxu1 %vm1104_vm0, %v1103_v0 }
  0x4c   : > { %938 = vmatmul.mubr.msk.f32.gmra.mxu0 %vm210_vm2, %v597_v49 }
  0x4d   : > { %940 = vmatprep.mubr.msk.f32.mxu0 %vm1104_vm0, %v1103_v0 }
  0x4e   : > { %924 = vmatmul.mubr.msk.f32.gmra.mxu1 %vm210_vm2, %v497_v51 }
  0x50   : > { %941 = vmatmul.mubr.msk.f32.gmra.mxu0 %vm210_vm2, %v599_v52 }
  0xee   : > { %v293_v53 = vpop.f32.mrf.mxu1 }
  0xef   : > { %v283_v54 = vpop.f32.mrf.mxu0 }
  0xf0   : > { %v874_v55 = vpop.f32.mrf.mxu1 }
  0xf1   : > { %v868_v56 = vpop.f32.mrf.mxu0 }
  0xf4   : > { %v288_v57 = vpop.f32.mrf.mxu0 }
  0xf6   : > { %v871_v58 = vpop.f32.mrf.mxu0 }
  0xf8   : > { %v369_v59 = vpop.f32.mrf.mxu1 }
  0xf9   : > { %v370_v3 = vadd.f32 %v369_v59, %v283_v54 }
  0xfa   : > { %v468_v60 = vpop.f32.mrf.mxu0  ;;  %v885_v61 = vpop.f32.mrf.mxu1 }
  0xfb   : > { %v482_v7 = vadd.f32 %v468_v60, %v370_v3 }
  0xfc   : > { %v902_v62 = vpop.f32.mrf.mxu0 }
  0xfd   : > { %v374_v63 = vpop.f32.mrf.mxu1 }
  0xfe   : > { %v473_v0 = vpop.f32.mrf.mxu0  ;;  %v375_v8 = vadd.f32 %v374_v63, %v288_v57 }
  0xff   : > { %v888_v1 = vpop.f32.mrf.mxu1 }
 0x100   : > { %v905_v2 = vpop.f32.mrf.mxu0  ;;  %v483_v15 = vadd.f32 %v473_v0, %v375_v8 }
 0x102   : > { %v379_v4 = vpop.f32.mrf.mxu1 }
 0x103   : > { %v478_v5 = vpop.f32.mrf.mxu0  ;;  %v380_v16 = vadd.f32 %v379_v4, %v293_v53 }
 0x104   : > { %v891_v6 = vpop.f32.mrf.mxu1 }
 0x105   : > { %v908_v9 = vpop.f32.mrf.mxu0  ;;  %v484_v24 = vadd.f32 %v478_v5, %v380_v16 }
 0x106   : > { %v570_v10 = vpop.f32.mrf.mxu1 }
 0x107   : > { %v584_v11 = vadd.f32 %v570_v10, %v482_v7 }
 0x108   : > { %v672_v12 = vpop.f32.mrf.mxu0  ;;  %v919_v14 = vpop.f32.mrf.mxu1 }
 0x109   : > { %v686_v17 = vadd.f32 %v672_v12, %v584_v11 }
 0x10a   : > { %v936_v18 = vpop.f32.mrf.mxu0  ;;  %v575_v19 = vpop.f32.mrf.mxu1 }
 0x10b   : > { %v696_v20 = vadd.f32 %v817_v13, %v686_v17  ;;  %v585_v21 = vadd.f32 %v575_v19, %v483_v15 }
 0x10c   : > { %v677_v22 = vpop.f32.mrf.mxu0  ;;  %v922_v23 = vpop.f32.mrf.mxu1 }
 0x10d   : > { %v699_v25 = vmax.f32 %v696_v20, 0.0  ;;  %v687_v26 = vadd.f32 %v677_v22, %v585_v21 }
 0x10e   : > { %v939_v27 = vpop.f32.mrf.mxu0  ;;  %v580_v28 = vpop.f32.mrf.mxu1 }
 0x10f   : > { %703 = vst.msk [vmem:[%s178_s20] sm:$0xff] %vm702_vm6, %v699_v25  ;;  %v697_v29 = vadd.f32 %v817_v13, %v687_v26  ;;  %v586_v30 = vadd.f32 %v580_v28, %v484_v24 }
 0x110   : > { %v682_v31 = vpop.f32.mrf.mxu0  ;;  %v925_v32 = vpop.f32.mrf.mxu1 }
 0x111   : > { %v700_v33 = vmax.f32 %v697_v29, 0.0  ;;  %v688_v34 = vadd.f32 %v682_v31, %v586_v30 }
 0x112   : > { %v942_v35 = vpop.f32.mrf.mxu0 }
 0x113   : > { %704 = vst.msk [vmem:[%s178_s20 + $0x8] sm:$0xff] %vm702_vm6, %v700_v33  ;;  %v698_v36 = vadd.f32 %v817_v13, %v688_v34 }
 0x115   : > { %v701_v37 = vmax.f32 %v698_v36, 0.0 }
 0x117   : > { %705 = vst.msk [vmem:[%s178_s20 + $0x10] sm:$0xff] %vm702_vm6, %v701_v37 }
 0x118   : > { %1047 = shalt.err (!%p1044_p0)
}
 0x119   : > { %s1048_s6 = scalar_lea.hbm %s1321_s28, 384  ;;  %s1052_s9 = scalar_lea.hbm %s1369_s3, 768 }
 0x11a   : > { %p1049_p1 = scmp.ne.s32.totalorder %s1321_s28, %s1048_s6  ;;  %p1053_p4 = scmp.lt.s32.totalorder %s1321_s28, %s1369_s3 }
 0x11b   : > { %p1054_p7 = scmp.lt.s32.totalorder %s1052_s9, %s1048_s6 }
 0x11c   : > { %p1050_p2 = pnand %p1049_p1, %p1166_p5 }
 0x11d   : > { %p1055_p8 = por %p1054_p7, %p1053_p4 }
 0x11e   : > { %p1051_p3 = pneg %p1050_p2 }
 0x120   : > { %p1056_p6 = pnand %p1055_p8, %p1051_p3 }
 0x122   : > { %1059 = shalt.err (!%p1056_p6)
}
 0x123   : > { %s1106_s17 = smov 128   ;;  %s1107_s19 = smov 8  }
 0x124   : > { %956 = dma.vmem_to_hbm [thread:$0]  (%p1166_p5), %s1316_s24, 384, %s1321_s28, %s1326_s29, %s1106_s17, %s1106_s17, %s1107_s19  }
 0x125 PF: > { %p968_p9 = scmp.ge.s32.totalorder %s1098_s15, 2  ;;  %s735_s20 = sand.u32 1, %s1086_s12  }
 0x126   : > { %p1373_p10 = scmp.ne.s32.totalorder %s1371_s23, 0  ;;  %s736_s25 = scalar_lea.sflag [#allocation4], %s735_s20 }
 0x128   : > { %p963_p11 = pnand %p968_p9, %p1373_p10 }
 0x12a   : > { %p964_p12 = pneg %p963_p11 }
 0x12c   : > { %1081 = dma.done.wait (%p964_p12), %s736_s25, 384  }
 0x12d   : > { %1083 = vsyncadd (%p964_p12), %s736_s25, 4294966912  ;;  %p14_p13 = scmp.ge.s32.totalorder %s1153_s18, 4   ;;  %s1374_s12 = smov %s1090_s13 }
 0x12e   : > { %s1375_s13 = smov %s1094_s14  ;;  %s1376_s14 = smov %s1164_s21 }
 0x12f   : > { %s1377_s15 = smov %s1153_s18  ;;  %16 = sbr.rel (!%p14_p13) target bundleno = 4 (0x4), region = 76 }
 0x134   :  { %741 = vsyncpa [#allocation3], 1 }
 0x135   :  { %743 = vsyncpa [#allocation3 + $0x1], 1 }
 0x136   :  { %744 = vsyncpa [#allocation4], 1 }
 0x137   :  { %746 = vsyncpa [#allocation4 + $0x1], 1 }

</bundles_post_ra>
